<compile_context>
chip_gen: v5e
topology: v5e:2x2
jax: 0.10.0
libtpu: 0.0.40
codegen_flags: <defaults>
</compile_context>

<pallas_src>
import functools
import math

import jax
import jax.numpy as jnp
from jax.experimental import pallas as pl
from jax.experimental.pallas import tpu as pltpu


def make_positional_encoding(max_len, d_model, dtype=jnp.float32):
    """Same construction as the PyTorch register_buffer 'pe' (without the
    leading unsqueeze(0)): shape (max_len, d_model)."""
    position = jnp.arange(max_len, dtype=jnp.float32)[:, None]
    div_term = jnp.exp(
        jnp.arange(0, d_model, 2, dtype=jnp.float32)
        * (-math.log(10000.0) / d_model))
    angles = position * div_term                      # (max_len, d_model//2)
    pe = jnp.zeros((max_len, d_model), dtype=jnp.float32)
    pe = pe.at[:, 0::2].set(jnp.sin(angles))
    pe = pe.at[:, 1::2].set(jnp.cos(angles))
    return pe.astype(dtype)


# ----------------------------------------------------------------------------
# Kernels (operate on the flattened, lane-dense layout).
#   x_ref / o_ref : (batch, tile)
#   pe_ref        : (1, tile)       -> broadcast add over batch
# ----------------------------------------------------------------------------

def _pe_add_kernel(x_ref, pe_ref, o_ref):
    o_ref[...] = x_ref[...] + pe_ref[...]


def _pe_add_dropout_kernel(seed_ref, x_ref, pe_ref, o_ref, *, p, flat_len):
    t = pl.program_id(0)
    nb, tile = o_ref.shape

    y = x_ref[...] + pe_ref[...]

    # Portable per-element random bits: hash of the global element id + seed.
    row = jax.lax.broadcasted_iota(jnp.int32, (nb, tile), 0)
    col = jax.lax.broadcasted_iota(jnp.int32, (nb, tile), 1)
    gid = row * jnp.int32(flat_len) + (t * jnp.int32(tile) + col)

    seed_u32 = seed_ref[0].astype(jnp.uint32) * jnp.uint32(0x9E3779B9)
    h = gid.astype(jnp.uint32) ^ seed_u32
    h = (h ^ (h >> 16)) * jnp.uint32(0x7FEB352D)      # lowbias32 mix
    h = (h ^ (h >> 15)) * jnp.uint32(0x846CA68B)
    h = h ^ (h >> 16)

    # keep with probability (1 - p): compare top 24 random bits against an
    # integer threshold (no bitcast / float-uniform construction needed).
    bits24 = (h >> 8).astype(jnp.int32)               # in [0, 2^24)
    thresh = jnp.int32(int(round(p * float(1 << 24))))
    keep = bits24 >= thresh

    scale = jnp.asarray(1.0 / (1.0 - p), dtype=y.dtype)
    o_ref[...] = jnp.where(keep, y * scale, jnp.zeros_like(y))


# ----------------------------------------------------------------------------
# Wrapper
# ----------------------------------------------------------------------------

_VMEM_WORKSET_BUDGET = 16 * 1024 * 1024   # target double-buffered block bytes


def _flat_tile(flat_len, batch, itemsize):
    """Largest lane-dense (multiple-of-128) tile whose double-buffered
    footprint 2*(2*batch + 1)*tile*itemsize stays under the VMEM budget."""
    if flat_len <= 128:
        return flat_len                     # full-extent last dim: always legal
    max_t = _VMEM_WORKSET_BUDGET // (2 * (2 * batch + 1) * itemsize)
    t = min(flat_len, 32768, max_t)
    t = max(128, (t // 128) * 128)
    return t


def positional_encoding_forward(x, pe, *, p=0.0, training=False, seed=0):
    """x: [batch, seq, d_model]; pe: [max_len, d_model] (full buffer).

    Returns x + pe[:seq] with dropout applied when training and p > 0."""
    batch, seq, d_model = x.shape
    max_len, d_model_pe = pe.shape
    assert d_model_pe == d_model and seq <= max_len
    assert 0.0 <= p < 1.0

    # Lane-dense layout: collapse (seq, d_model) into one flat axis so the
    # output's last dim is a big multiple of 128 regardless of d_model.
    # Both reshapes are contiguous (free under jit).
    flat_len = seq * d_model
    x2 = x.reshape(batch, flat_len)
    # The flattened PE buffer has the exact values needed at flattened offset
    # k for every k < flat_len, so no wrapper-side slice/copy of pe[:seq].
    # (For bf16 models, store pe pre-cast to x.dtype to halve PE HBM bytes.)
    pe2 = pe.astype(x.dtype).reshape(1, max_len * d_model)

    itemsize = jnp.dtype(x.dtype).itemsize
    tile = _flat_tile(flat_len, batch, itemsize)
    if tile % 128 != 0:
        # Tiny-model fallback: make the PE block full-extent too.
        pe2 = pe2[:, :flat_len]
    grid = (pl.cdiv(flat_len, tile),)

    cost = pl.CostEstimate(
        flops=batch * flat_len,
        transcendentals=0,
        bytes_accessed=(2 * batch * flat_len + flat_len) * itemsize)

    cparams = pltpu.CompilerParams(
        dimension_semantics=("parallel",),
        vmem_limit_bytes=2 * _VMEM_WORKSET_BUDGET)

    out_shape = jax.ShapeDtypeStruct((batch, flat_len), x.dtype)

    if training and p > 0.0:
        seed_arr = jnp.asarray([seed], dtype=jnp.int32)
        grid_spec = pltpu.PrefetchScalarGridSpec(
            num_scalar_prefetch=1,
            grid=grid,
            in_specs=[
                pl.BlockSpec((batch, tile), lambda t, sref: (0, t)),
                pl.BlockSpec((1, tile), lambda t, sref: (0, t)),
            ],
            out_specs=pl.BlockSpec((batch, tile), lambda t, sref: (0, t)),
        )
        y2 = pl.pallas_call(
            functools.partial(_pe_add_dropout_kernel, p=float(p),
                              flat_len=flat_len),
            out_shape=out_shape,
            grid_spec=grid_spec,
            compiler_params=cparams,
            cost_estimate=cost,
        )(seed_arr, x2, pe2)
    else:
        grid_spec = pltpu.PrefetchScalarGridSpec(
            num_scalar_prefetch=0,
            grid=grid,
            in_specs=[
                pl.BlockSpec((batch, tile), lambda t: (0, t)),
                pl.BlockSpec((1, tile), lambda t: (0, t)),
            ],
            out_specs=pl.BlockSpec((batch, tile), lambda t: (0, t)),
        )
        y2 = pl.pallas_call(
            _pe_add_kernel,
            out_shape=out_shape,
            grid_spec=grid_spec,
            compiler_params=cparams,
            cost_estimate=cost,
        )(x2, pe2)

    return y2.reshape(batch, seq, d_model)


if __name__ == "__main__":
    # Small shapes consistent with the module: batch=2, seq=8, d_model=32.
    batch, seq, d_model = 2, 8, 32
    p = 0.1
    max_len = 5000  # module default

    key = jax.random.PRNGKey(0)
    x = jax.random.normal(key, (batch, seq, d_model), dtype=jnp.float32)
    pe = make_positional_encoding(max_len, d_model, dtype=jnp.float32)

    # Eval-mode forward (dropout is identity) -- exact reference check.
    out = positional_encoding_forward(x, pe, p=p, training=False)
    out = jax.block_until_ready(out)
    ref = x + pe[:seq][None, :, :]
    assert out.shape == x.shape
    assert jnp.allclose(out, ref, atol=1e-6, rtol=1e-6)

    # Training-mode forward (in-kernel hash-PRNG dropout): every element must
    # be either 0 or the PE-added value scaled by 1/(1-p).
    out_t = positional_encoding_forward(x, pe, p=p, training=True, seed=1234)
    out_t = jax.block_until_ready(out_t)
    scaled = ref / (1.0 - p)
    ok = jnp.isclose(out_t, 0.0, atol=1e-6) | jnp.isclose(
        out_t, scaled, atol=1e-5, rtol=1e-5)
    assert bool(jnp.all(ok))

    print("KERNEL_OK")
</pallas_src>

<mosaic_0001>
module attributes {stable_mosaic.version = 11 : i64} {
  func.func @_pe_add_kernel(%arg0: i32, %arg1: memref<2x256xf32, #tpu.memory_space<vmem>>, %arg2: memref<1x256xf32, #tpu.memory_space<vmem>>, %arg3: memref<2x256xf32, #tpu.memory_space<vmem>>) attributes {dimension_semantics = [#tpu.dimension_semantics<parallel>], iteration_bounds = array<i64: 1>, scalar_prefetch = 0 : i64, scratch_operands = 0 : i64, tpu.core_type = #tpu.core_type<tc>, window_params = [{transform_indices = @transform_0, window_bounds = array<i64: 2, 256>}, {transform_indices = @transform_1, window_bounds = array<i64: 1, 256>}, {transform_indices = @transform_2, window_bounds = array<i64: 2, 256>}]} {
    %c0 = arith.constant 0 : index
    %c0_0 = arith.constant 0 : index
    %0 = vector.load %arg1[%c0, %c0_0] : memref<2x256xf32, #tpu.memory_space<vmem>>, vector<2x256xf32>
    %c0_1 = arith.constant 0 : index
    %c0_2 = arith.constant 0 : index
    %1 = vector.load %arg2[%c0_1, %c0_2] : memref<1x256xf32, #tpu.memory_space<vmem>>, vector<1x256xf32>
    %2 = vector.broadcast %1 : vector<1x256xf32> to vector<2x256xf32>
    %3 = arith.addf %0, %2 : vector<2x256xf32>
    %c0_3 = arith.constant 0 : index
    %c0_4 = arith.constant 0 : index
    %4 = vector.load %arg3[%c0_3, %c0_4] : memref<2x256xf32, #tpu.memory_space<vmem>>, vector<2x256xf32>
    tpu.vector_store %arg3[%c0_3, %c0_4], %3 {strides = array<i32>} : memref<2x256xf32, #tpu.memory_space<vmem>>, vector<2x256xf32>,
    return
  }
  func.func @transform_0(%arg0: i32) -> (i32, i32) {
    %c0_i32 = arith.constant 0 : i32
    %c0_i32_0 = arith.constant 0 : i32
    return %c0_i32, %arg0 : i32, i32
  }
  func.func @transform_1(%arg0: i32) -> (i32, i32) {
    %c0_i32 = arith.constant 0 : i32
    %c0_i32_0 = arith.constant 0 : i32
    return %c0_i32, %arg0 : i32, i32
  }
  func.func @transform_2(%arg0: i32) -> (i32, i32) {
    %c0_i32 = arith.constant 0 : i32
    %c0_i32_0 = arith.constant 0 : i32
    return %c0_i32, %arg0 : i32, i32
  }
}

</mosaic_0001>

<bundles_post_ra>
// kernel: tpu_custom_call.1
= control target key start
LH: loop header
LB: loop body
LE: loop exit
PB: predicated region body
PF: predicated region fallthrough
CT: control target
= control target key end

     0   :  { %7 = vsyncpa [#allocation3], 0  ;;  %s177_s0 = inlined_call_operand.hbm [shape: f32[2,256], index: 0, kind: input, shape index: {}]   ;;  %s178_s1 = inlined_call_operand.hbm [shape: f32[1,160000], index: 1, kind: input, shape index: {}]   ;;  %s179_s2 = inlined_call_operand.hbm [shape: f32[2,256], index: 2, kind: output, shape index: {}]  }
   0x1   :  { %8 = vsyncpa [#allocation6], 0 }
   0x2   :  { %9 = vsyncpa [#allocation4], 0  ;;  %s15_s11 = sshll.u32 %s177_s0, 4  ;;  %s150_s12 = smov [#allocation2]   ;;  %s16_s11 = int_to_ptr.hbm [resolvable:$true] %s15_s11 }
   0x3   :  { %s17_s13 = sshll.u32 %s150_s12, 4  ;;  %s26_s16 = sshll.u32 %s178_s1, 4  ;;  %s18_s13 = int_to_ptr.vmem [resolvable:$true] %s17_s13  ;;  %s27_s16 = int_to_ptr.hbm [resolvable:$true] %s26_s16 }
   0x4   :  { %20 = dma.hbm_to_vmem [thread:$0]  %s16_s11, 64, %s18_s13, [#allocation3]  }
   0x5   :  { %s151_s17 = smov [#allocation5]  }
   0x6   :  { %s28_s18 = sshll.u32 %s151_s17, 4  ;;  %s29_s18 = int_to_ptr.vmem [resolvable:$true] %s28_s18 }
   0x7   :  { %31 = dma.hbm_to_vmem [thread:$0]  %s27_s16, 32, %s29_s18, [#allocation6]  }
   0x8   :  { %144 = dma.done.wait [#allocation3], 64  }
   0x9   :  { %145 = vsyncadd [#allocation3], 4294967232 }
   0xa   :  { %146 = dma.done.wait [#allocation6], 32  }
   0xb   :  { %147 = vsyncadd [#allocation6], 4294967264  ;;  %v41_v0 = vld [vmem:[#allocation5] sm:$0x3]  ;;  %vm46_vm0 = vcmask 1041408   ;;  %s152_s0 = smov [#allocation7]  }
   0xc   :  { %v43_v1 = vperm.slane %v41_v0, 0  ;;  %v44_v2 = vperm.slane %v41_v0, 1  ;;  %v40_v3 = vld [vmem:[#allocation2] sm:$0xf]  ;;  %s56_s19 = sshll.u32 %s152_s0, 4  ;;  %s58_s21 = sshll.u32 %s179_s2, 4  ;;  %s57_s19 = int_to_ptr.vmem [resolvable:$true] %s56_s19  ;;  %s59_s21 = int_to_ptr.hbm [resolvable:$true] %s58_s21 }
   0xe   :  { %v45_v4 = vrot.slane %v44_v2, 6 }
  0x10   :  { %v47_v5 = vsel %vm46_vm0, %v43_v1, %v45_v4 }
  0x11   :  { %v49_v6 = vadd.f32 %v47_v5, %v40_v3 }
  0x13   :  { %50 = vst [vmem:[#allocation7] sm:$0xf] %v49_v6 }
  0x14   :  { %61 = dma.vmem_to_hbm [thread:$0]  %s57_s19, 64, %s59_s21, [#allocation4]  }
  0x15   :  { %148 = dma.done.wait [#allocation4], 64  }
  0x16   :  { %149 = vsyncadd [#allocation4], 4294967232 }
  0x17   :  { %66 = vsyncpa [#allocation3], 1 }
  0x18   :  { %67 = vsyncpa [#allocation6], 1 }
  0x19   :  { %68 = vsyncpa [#allocation4], 1 }

</bundles_post_ra>
